<compile_context>
chip_gen: v5e
topology: v5e:2x2
jax: 0.10.0
libtpu: 0.0.40
codegen_flags: <defaults>
</compile_context>

<pallas_src>
import functools

import jax
import jax.numpy as jnp
from jax.experimental import pallas as pl
from jax.experimental.pallas import tpu as pltpu


def _jsd_kernel(p_ref, q_ref, o_ref, *, total_rows, rows_tile, mask_tail):
    # p_ref / q_ref: (rows_tile, D) block of logits; o_ref: (8, 128) partial tile.
    P = p_ref[...].astype(jnp.float32)
    Q = q_ref[...].astype(jnp.float32)

    # --- log_softmax(M) with M = 0.5*(P+Q); M itself is dead right after.
    M = 0.5 * (P + Q)
    sM = M - jnp.max(M, axis=-1, keepdims=True)
    lsM = sM - jnp.log(jnp.sum(jnp.exp(sM), axis=-1, keepdims=True))

    # --- P-term: one exp shared between softmax(P) and log_softmax(P).
    #     The softmax normalization is factored out of the elementwise product:
    #     one per-row reciprocal-mul instead of a full-block multiply + pP temp.
    sP = P - jnp.max(P, axis=-1, keepdims=True)
    eP = jnp.exp(sP)
    sumP = jnp.sum(eP, axis=-1, keepdims=True)
    lsP = sP - jnp.log(sumP)
    rowP = jnp.sum(eP * (lsP - lsM), axis=-1, keepdims=True) * pl.reciprocal(sumP)

    # --- Q-term, computed sequentially to keep live (rows_tile, D) buffers low.
    sQ = Q - jnp.max(Q, axis=-1, keepdims=True)
    eQ = jnp.exp(sQ)
    sumQ = jnp.sum(eQ, axis=-1, keepdims=True)
    lsQ = sQ - jnp.log(sumQ)
    rowQ = jnp.sum(eQ * (lsQ - lsM), axis=-1, keepdims=True) * pl.reciprocal(sumQ)

    row_kl = rowP + rowQ                                   # (rows_tile, 1)

    if mask_tail:
        # The last block may extend past the (un-padded) inputs; those rows hold
        # garbage (possibly NaN/Inf).  Select — not multiply — per row BEFORE
        # the block reduce so nothing propagates into the partial sum.
        gid = (pl.program_id(0) * rows_tile
               + jax.lax.broadcasted_iota(jnp.int32, row_kl.shape, 0))
        row_kl = jnp.where(gid < total_rows, row_kl, jnp.float32(0.0))

    partial = jnp.sum(row_kl)          # scalar KL(P||M)+KL(Q||M) contribution

    # Lane-dense per-block output: scalar at [0, 0], zeros elsewhere.
    r = jax.lax.broadcasted_iota(jnp.int32, (8, 128), 0)
    c = jax.lax.broadcasted_iota(jnp.int32, (8, 128), 1)
    o_ref[...] = jnp.where((r == 0) & (c == 0), partial, jnp.float32(0.0))


def _pick_rows_tile(R, D, itemsize):
    # Working-set budget per grid step: 2 inputs x 2 pipeline buffers in the
    # input dtype + ~8 live full-block f32 intermediates.  Kept well under the
    # 48 MiB vmem limit below (and v7x's 64 MiB physical VMEM).
    budget = 24 << 20
    per_row = 2 * 2 * D * itemsize + 8 * D * 4
    rows = budget // max(per_row, 1)
    # Also target ~2 MiB per input block: big enough to amortize the ~0.35 us
    # per-grid-step overhead, small enough to double-buffer comfortably.
    rows = min(rows, (2 << 20) // max(D * itemsize, 1))
    rows = max(8, (rows // 8) * 8)     # sublane-aligned
    return int(rows)


@functools.partial(jax.jit, static_argnames=("rows_tile", "multicore"))
def js_divergence(P, Q, *, rows_tile=None, multicore=False):
    assert P.shape == Q.shape, (P.shape, Q.shape)
    assert P.dtype == Q.dtype, (P.dtype, Q.dtype)   # mixed dtypes change HBM traffic

    D = int(P.shape[-1])
    R = 1
    for d in P.shape[:-1]:
        R *= int(d)
    R = max(R, 1)

    # Flatten to (rows, D); the softmax axis (D) stays the lane axis.  Inputs
    # are NOT up-cast here — bf16 logits travel as bf16 over HBM and are only
    # promoted to f32 inside the kernel.
    P2 = P.reshape(R, D)
    Q2 = Q.reshape(R, D)

    itemsize = jnp.dtype(P.dtype).itemsize
    if rows_tile is None:
        rows_tile = _pick_rows_tile(R, D, itemsize)
    else:
        rows_tile = max(8, (int(rows_tile) // 8) * 8)
    if rows_tile >= R:
        # Single full-extent block: no ragged tail and no (8, _) constraint
        # (block shape equals the full array dims).
        rows_tile = R

    num_tiles = pl.cdiv(R, rows_tile)
    mask_tail = (R % rows_tile) != 0

    kernel = functools.partial(
        _jsd_kernel, total_rows=R, rows_tile=rows_tile, mask_tail=mask_tail)

    # Per-block partial sums make the grid axis race-free; on v7x pass
    # multicore=True to shard it across both TensorCores.
    dims = (pltpu.CORE_PARALLEL,) if multicore else ("parallel",)

    partials = pl.pallas_call(
        kernel,
        out_shape=jax.ShapeDtypeStruct((num_tiles * 8, 128), jnp.float32),
        grid_spec=pltpu.PrefetchScalarGridSpec(
            num_scalar_prefetch=0,
            grid=(num_tiles,),
            in_specs=[
                pl.BlockSpec((rows_tile, D), lambda i: (i, 0)),
                pl.BlockSpec((rows_tile, D), lambda i: (i, 0)),
            ],
            out_specs=pl.BlockSpec((8, 128), lambda i: (i, 0)),
        ),
        compiler_params=pltpu.CompilerParams(
            dimension_semantics=dims,
            vmem_limit_bytes=48 * 1024 * 1024,
        ),
    )(P2, Q2)

    # Final reduction + the 0.5 JS factor, fused into the same jit.
    return 0.5 * jnp.sum(partials)


def js_divergence_ref(P, Q):
    # pure-JAX reference mirroring the PyTorch code
    def kld(A, B):
        pa = jax.nn.softmax(A, axis=-1)
        return jnp.sum(pa * (jax.nn.log_softmax(A, axis=-1) -
                             jax.nn.log_softmax(B, axis=-1)))
    M = 0.5 * (P + Q)
    return 0.5 * (kld(P, M) + kld(Q, M))


if __name__ == "__main__":
    key = jax.random.PRNGKey(0)
    kp, kq = jax.random.split(key)

    # batch=2, seq=8, hidden=32
    B, S, D = 2, 8, 32
    P = jax.random.normal(kp, (B, S, D), dtype=jnp.float32)
    Q = jax.random.normal(kq, (B, S, D), dtype=jnp.float32)

    out = jax.block_until_ready(js_divergence(P, Q))
    ref = jax.block_until_ready(js_divergence_ref(P, Q))
    assert jnp.allclose(out, ref, atol=1e-5, rtol=1e-5), (out, ref)

    # Exercise the ragged-tail path (R=24 with a forced 16-row tile): checks
    # that the in-kernel masking (which replaced the jnp.pad copy) is correct.
    P3 = jax.random.normal(kp, (3, 8, D), dtype=jnp.float32)
    Q3 = jax.random.normal(kq, (3, 8, D), dtype=jnp.float32)
    out3 = jax.block_until_ready(js_divergence(P3, Q3, rows_tile=16))
    ref3 = jax.block_until_ready(js_divergence_ref(P3, Q3))
    assert jnp.allclose(out3, ref3, atol=1e-5, rtol=1e-5), (out3, ref3)

    print("KERNEL_OK")
</pallas_src>

<mosaic_0001>
module attributes {stable_mosaic.version = 11 : i64} {
  func.func @_jsd_kernel(%arg0: i32, %arg1: memref<16x32xf32, #tpu.memory_space<vmem>>, %arg2: memref<16x32xf32, #tpu.memory_space<vmem>>, %arg3: memref<8x128xf32, #tpu.memory_space<vmem>>) attributes {dimension_semantics = [#tpu.dimension_semantics<parallel>], iteration_bounds = array<i64: 1>, scalar_prefetch = 0 : i64, scratch_operands = 0 : i64, tpu.core_type = #tpu.core_type<tc>, window_params = [{transform_indices = @transform_0, window_bounds = array<i64: 16, 32>}, {transform_indices = @transform_1, window_bounds = array<i64: 16, 32>}, {transform_indices = @transform_2, window_bounds = array<i64: 8, 128>}]} {
    %c0 = arith.constant 0 : index
    %c0_0 = arith.constant 0 : index
    %0 = vector.load %arg1[%c0, %c0_0] : memref<16x32xf32, #tpu.memory_space<vmem>>, vector<16x32xf32>
    %c0_1 = arith.constant 0 : index
    %c0_2 = arith.constant 0 : index
    %1 = vector.load %arg2[%c0_1, %c0_2] : memref<16x32xf32, #tpu.memory_space<vmem>>, vector<16x32xf32>
    %2 = arith.addf %0, %1 : vector<16x32xf32>
    %cst = arith.constant 5.000000e-01 : f32
    %3 = vector.broadcast %cst : f32 to vector<16x32xf32>
    %4 = arith.mulf %3, %2 : vector<16x32xf32>
    %cst_3 = arith.constant dense<0xFF800000> : vector<16xf32>
    %5 = vector.multi_reduction <maximumf>, %4, %cst_3 [1] : vector<16x32xf32> to vector<16xf32>
    %6 = vector.shape_cast %5 : vector<16xf32> to vector<16x1xf32>
    %7 = vector.broadcast %6 : vector<16x1xf32> to vector<16x32xf32>
    %8 = arith.subf %4, %7 : vector<16x32xf32>
    %9 = math.exp %8 : vector<16x32xf32>
    %cst_4 = arith.constant dense<0.000000e+00> : vector<16xf32>
    %10 = vector.multi_reduction <add>, %9, %cst_4 [1] : vector<16x32xf32> to vector<16xf32>
    %11 = vector.shape_cast %10 : vector<16xf32> to vector<16x1xf32>
    %12 = math.log %11 : vector<16x1xf32>
    %13 = vector.broadcast %12 : vector<16x1xf32> to vector<16x32xf32>
    %14 = arith.subf %8, %13 : vector<16x32xf32>
    %cst_5 = arith.constant dense<0xFF800000> : vector<16xf32>
    %15 = vector.multi_reduction <maximumf>, %0, %cst_5 [1] : vector<16x32xf32> to vector<16xf32>
    %16 = vector.shape_cast %15 : vector<16xf32> to vector<16x1xf32>
    %17 = vector.broadcast %16 : vector<16x1xf32> to vector<16x32xf32>
    %18 = arith.subf %0, %17 : vector<16x32xf32>
    %19 = math.exp %18 : vector<16x32xf32>
    %cst_6 = arith.constant dense<0.000000e+00> : vector<16xf32>
    %20 = vector.multi_reduction <add>, %19, %cst_6 [1] : vector<16x32xf32> to vector<16xf32>
    %21 = vector.shape_cast %20 : vector<16xf32> to vector<16x1xf32>
    %22 = math.log %21 : vector<16x1xf32>
    %23 = vector.broadcast %22 : vector<16x1xf32> to vector<16x32xf32>
    %24 = arith.subf %18, %23 : vector<16x32xf32>
    %25 = arith.subf %24, %14 : vector<16x32xf32>
    %26 = arith.mulf %19, %25 : vector<16x32xf32>
    %cst_7 = arith.constant dense<0.000000e+00> : vector<16xf32>
    %27 = vector.multi_reduction <add>, %26, %cst_7 [1] : vector<16x32xf32> to vector<16xf32>
    %28 = vector.shape_cast %27 : vector<16xf32> to vector<16x1xf32>
    %29 = tpu.reciprocal %21 : vector<16x1xf32> -> vector<16x1xf32>
    %30 = arith.mulf %28, %29 : vector<16x1xf32>
    %cst_8 = arith.constant dense<0xFF800000> : vector<16xf32>
    %31 = vector.multi_reduction <maximumf>, %1, %cst_8 [1] : vector<16x32xf32> to vector<16xf32>
    %32 = vector.shape_cast %31 : vector<16xf32> to vector<16x1xf32>
    %33 = vector.broadcast %32 : vector<16x1xf32> to vector<16x32xf32>
    %34 = arith.subf %1, %33 : vector<16x32xf32>
    %35 = math.exp %34 : vector<16x32xf32>
    %cst_9 = arith.constant dense<0.000000e+00> : vector<16xf32>
    %36 = vector.multi_reduction <add>, %35, %cst_9 [1] : vector<16x32xf32> to vector<16xf32>
    %37 = vector.shape_cast %36 : vector<16xf32> to vector<16x1xf32>
    %38 = math.log %37 : vector<16x1xf32>
    %39 = vector.broadcast %38 : vector<16x1xf32> to vector<16x32xf32>
    %40 = arith.subf %34, %39 : vector<16x32xf32>
    %41 = arith.subf %40, %14 : vector<16x32xf32>
    %42 = arith.mulf %35, %41 : vector<16x32xf32>
    %cst_10 = arith.constant dense<0.000000e+00> : vector<16xf32>
    %43 = vector.multi_reduction <add>, %42, %cst_10 [1] : vector<16x32xf32> to vector<16xf32>
    %44 = vector.shape_cast %43 : vector<16xf32> to vector<16x1xf32>
    %45 = tpu.reciprocal %37 : vector<16x1xf32> -> vector<16x1xf32>
    %46 = arith.mulf %44, %45 : vector<16x1xf32>
    %47 = arith.addf %30, %46 : vector<16x1xf32>
    %48 = vector.shape_cast %47 : vector<16x1xf32> to vector<1x16x1xf32>
    %cst_11 = arith.constant dense<0.000000e+00> : vector<1xf32>
    %49 = vector.multi_reduction <add>, %48, %cst_11 [1, 2] : vector<1x16x1xf32> to vector<1xf32>
    %50 = vector.shape_cast %49 : vector<1xf32> to vector<1x1x1xf32>
    %51 = vector.extract %50[0, 0, 0] : f32 from vector<1x1x1xf32>
    %52 = tpu.iota {dimensions = array<i32: 0>} : vector<8x128xi32>
    %53 = tpu.iota {dimensions = array<i32: 1>} : vector<8x128xi32>
    %c0_i32 = arith.constant 0 : i32
    %54 = vector.broadcast %c0_i32 : i32 to vector<8x128xi32>
    %55 = arith.cmpi eq, %52, %54 : vector<8x128xi32>
    %c0_i32_12 = arith.constant 0 : i32
    %56 = vector.broadcast %c0_i32_12 : i32 to vector<8x128xi32>
    %57 = arith.cmpi eq, %53, %56 : vector<8x128xi32>
    %58 = arith.andi %55, %57 : vector<8x128xi1>
    %cst_13 = arith.constant 0.000000e+00 : f32
    %59 = vector.broadcast %51 : f32 to vector<8x128xf32>
    %60 = vector.broadcast %cst_13 : f32 to vector<8x128xf32>
    %61 = arith.select %58, %59, %60 : vector<8x128xi1>, vector<8x128xf32>
    %c0_14 = arith.constant 0 : index
    %c0_15 = arith.constant 0 : index
    %62 = vector.load %arg3[%c0_14, %c0_15] : memref<8x128xf32, #tpu.memory_space<vmem>>, vector<8x128xf32>
    tpu.vector_store %arg3[%c0_14, %c0_15], %61 {strides = array<i32>} : memref<8x128xf32, #tpu.memory_space<vmem>>, vector<8x128xf32>,
    return
  }
  func.func @transform_0(%arg0: i32) -> (i32, i32) {
    %c0_i32 = arith.constant 0 : i32
    %c0_i32_0 = arith.constant 0 : i32
    return %arg0, %c0_i32 : i32, i32
  }
  func.func @transform_1(%arg0: i32) -> (i32, i32) {
    %c0_i32 = arith.constant 0 : i32
    %c0_i32_0 = arith.constant 0 : i32
    return %arg0, %c0_i32 : i32, i32
  }
  func.func @transform_2(%arg0: i32) -> (i32, i32) {
    %c0_i32 = arith.constant 0 : i32
    %c0_i32_0 = arith.constant 0 : i32
    return %arg0, %c0_i32 : i32, i32
  }
}

</mosaic_0001>

<bundles_post_ra>
// kernel: js_divergence.1
= control target key start
LH: loop header
LB: loop body
LE: loop exit
PB: predicated region body
PF: predicated region fallthrough
CT: control target
= control target key end

     0   :  { %7 = vsyncpa [#allocation3], 0  ;;  %s431_s0 = inlined_call_operand.hbm [shape: f32[16,32], index: 0, kind: input, shape index: {}]   ;;  %s432_s1 = inlined_call_operand.hbm [shape: f32[16,32], index: 1, kind: input, shape index: {}]   ;;  %s433_s2 = inlined_call_operand.vmem [shape: f32[8,128], index: 2, kind: output, shape index: {}]  }
   0x1   :  { %s13_s11 = sshll.u32 %s431_s0, 4  ;;  %s14_s11 = int_to_ptr.hbm [resolvable:$true] %s13_s11 }
   0x2   :  { %8 = vsyncpa [#allocation5], 0  ;;  %s325_s12 = smov [#allocation2]   ;;  %s26_s16 = sshll.u32 %s432_s1, 4  ;;  %s27_s16 = int_to_ptr.hbm [resolvable:$true] %s26_s16 }
   0x3   :  { %s15_s13 = sshll.u32 %s325_s12, 4  ;;  %s326_s17 = smov 128   ;;  %s16_s13 = int_to_ptr.vmem [resolvable:$true] %s15_s13 }
   0x4   :  { %s327_s18 = smov 8   ;;  %s328_s19 = smov [#allocation4]  }
   0x5   :  { %21 = dma.hbm_to_vmem [thread:$0]  %s14_s11, 256, %s16_s13, [#allocation3], %s326_s17, %s326_s17, %s327_s18  }
   0x6   :  { %s28_s20 = sshll.u32 %s328_s19, 4  ;;  %s29_s20 = int_to_ptr.vmem [resolvable:$true] %s28_s20 }
   0x7   :  { %34 = dma.hbm_to_vmem [thread:$0]  %s27_s16, 256, %s29_s20, [#allocation5], %s326_s17, %s326_s17, %s327_s18  }
   0x8   :  { %321 = dma.done.wait [#allocation3], 256  }
   0x9   :  { %322 = vsyncadd [#allocation3], 4294967040 }
   0xa   :  { %323 = dma.done.wait [#allocation5], 256  }
   0xb   :  { %324 = vsyncadd [#allocation5], 4294967040  ;;  %vm51_vm0 = vcmask 261120   ;;  %v45_v0 = vld [vmem:[#allocation4] sm:$0xff]  ;;  %v43_v1 = vld [vmem:[#allocation2] sm:$0xff] }
   0xc   :  { %v46_v2 = vld [vmem:[#allocation4 + $0x8] sm:$0xff]  ;;  %v140_v3 = vsel %vm51_vm0, %v45_v0, -inf  ;;  %v76_v4 = vsel %vm51_vm0, %v43_v1, -inf  ;;  %v47_v5 = vadd.f32 %v45_v0, %v43_v1  ;;  %v44_v6 = vld [vmem:[#allocation2 + $0x8] sm:$0xff] }
   0xd   :  { %141 = vmax.xlane.f32.xlu2 %v140_v3  ;;  %77 = vmax.xlane.f32.xlu1 %v76_v4  ;;  %v48_v8 = vadd.f32 %v46_v2, %v44_v6  ;;  %v143_v10 = vsel %vm51_vm0, %v46_v2, -inf  ;;  %v79_v11 = vsel %vm51_vm0, %v44_v6, -inf }
   0xe   :  { %v49_v7 = vmul.f32 0.5, %v47_v5 }
   0xf   :  { %v50_v12 = vmul.f32 0.5, %v48_v8 }
  0x10   :  { %v52_v9 = vsel %vm51_vm0, %v49_v7, -inf }
  0x11   :  { %53 = vmax.xlane.f32.xlu0 %v52_v9  ;;  %v55_v13 = vsel %vm51_vm0, %v50_v12, -inf }
  0x15   :  { %144 = vmax.xlane.f32.xlu2 %v143_v10  ;;  %80 = vmax.xlane.f32.xlu1 %v79_v11 }
  0x19   :  { %56 = vmax.xlane.f32.xlu0 %v55_v13 }
  0x80   :  { %v142_v14 = vpop.xlane.xlu2 %141  ;;  %v78_v15 = vpop.xlane.xlu1 %77 }
  0x81   :  { %v82_v16 = vsub.f32 %v43_v1, %v78_v15  ;;  %v146_v32 = vsub.f32 %v45_v0, %v142_v14 }
  0x83   :  { %v84_v17 = vmul.f32 1.442695, %v82_v16  ;;  %v148_v36 = vmul.f32 1.442695, %v146_v32 }
  0x84   :  { %v54_v18 = vpop.xlane.xlu0 %53 }
  0x85   :  { %v58_v19 = vsub.f32 %v49_v7, %v54_v18  ;;  %241 = vpow2.f32 %v84_v17 }
  0x87   :  { %v60_v20 = vmul.f32 1.442695, %v58_v19 }
  0x88   :  { %v145_v21 = vpop.xlane.xlu2 %144  ;;  %v81_v22 = vpop.xlane.xlu1 %80 }
  0x89   :  { %243 = vpow2.f32 %v60_v20  ;;  %v147_v23 = vsub.f32 %v46_v2, %v145_v21  ;;  %v356_v24 = vsub.f32 %v44_v6, %v81_v22 }
  0x8b   :  { %v150_v25 = vmul.f32 1.442695, %v147_v23  ;;  %v86_v26 = vmul.f32 1.442695, %v356_v24  ;;  %v242_v27 = vpop.eup %241 }
  0x8c   :  { %v57_v28 = vpop.xlane.xlu0 %56  ;;  %v88_v30 = vsel %vm51_vm0, %v242_v27, 0.0 }
  0x8d   :  { %245 = vpow2.f32 %v150_v25  ;;  %v59_v29 = vsub.f32 %v50_v12, %v57_v28  ;;  %89 = vadd.xlane.f32.xlu2 %v88_v30 }
  0x8e   :  { %247 = vpow2.f32 %v86_v26 }
  0x8f   :  { %v244_v31 = vpop.eup %243  ;;  %v62_v33 = vmul.f32 1.442695, %v59_v29 }
  0x90   :  { %v64_v34 = vsel %vm51_vm0, %v244_v31, 0.0 }
  0x91   :  { %249 = vpow2.f32 %v62_v33  ;;  %65 = vadd.xlane.f32.xlu0 %v64_v34 }
  0x92   :  { %251 = vpow2.f32 %v148_v36 }
  0x93   :  { %v246_v35 = vpop.eup %245 }
  0x94   :  { %v248_v37 = vpop.eup %247  ;;  %v155_v38 = vsel %vm51_vm0, %v246_v35, 0.0 }
  0x95   :  { %156 = vadd.xlane.f32.xlu2 %v155_v38  ;;  %v91_v39 = vsel %vm51_vm0, %v248_v37, 0.0 }
  0x97   :  { %v250_v40 = vpop.eup %249 }
  0x98   :  { %v67_v41 = vsel %vm51_vm0, %v250_v40, 0.0  ;;  %v252_v42 = vpop.eup %251 }
  0x99   :  { %92 = vadd.xlane.f32.xlu0 %v91_v39  ;;  %68 = vadd.xlane.f32.xlu1 %v67_v41  ;;  %v152_v43 = vsel %vm51_vm0, %v252_v42, 0.0 }
  0xa1   :  { %153 = vadd.xlane.f32.xlu1 %v152_v43 }
 0x100   :  { %v365_v44 = vpop.xlane.xlu2 %89 }
 0x101   :  { %253 = vlog2.f32 %v365_v44  ;;  %vm115_vm6 = vweird.f32 %v365_v44  ;;  %v119_v39 = vand.u32 2147483647, %v365_v44 }
 0x103   :  { %vm120_vm14 = vcmp.eq.f32.partialorder %v119_v39, 8.507059e+37 }
 0x104   :  { %v66_v45 = vpop.xlane.xlu0 %65 }
 0x105   :  { %255 = vlog2.f32 %v66_v45 }
 0x107   :  { %v254_v46 = vpop.eup %253 }
 0x108   :  { %v368_v47 = vpop.xlane.xlu2 %156  ;;  %v95_v48 = vmul.f32 0.6931472, %v254_v46 }
 0x109   :  { %257 = vlog2.f32 %v368_v47  ;;  %vm193_vm1 = vweird.f32 %v368_v47  ;;  %v199_v33 = vand.u32 2147483648, %v368_v47 }
 0x10a   :  { %v98_v54 = vsub.f32 %v82_v16, %v95_v48 }
 0x10b   :  { %v256_v49 = vpop.eup %255  ;;  %v200_v46 = vor.u32 1.1754944e-38, %v199_v33 }
 0x10c   :  { %v71_v50 = vmul.f32 0.6931472, %v256_v49  ;;  %v69_v51 = vpop.xlane.xlu1 %68  ;;  %v371_v52 = vpop.xlane.xlu0 %92 }
 0x10d   :  { %259 = vlog2.f32 %v69_v51  ;;  %vm129_vm3 = vweird.f32 %v371_v52  ;;  %v133_v40 = vand.u32 2147483647, %v371_v52 }
 0x10e   :  { %v74_v53 = vsub.f32 %v58_v19, %v71_v50  ;;  %261 = vlog2.f32 %v371_v52 }
 0x10f   :  { %v258_v56 = vpop.eup %257  ;;  %vm134_vm12 = vcmp.eq.f32.partialorder %v133_v40, 8.507059e+37 }
 0x110   :  { %v100_v55 = vsub.f32 %v98_v54, %v74_v53  ;;  %v161_v58 = vmul.f32 0.6931472, %v258_v56 }
 0x112   :  { %v102_v57 = vmul.f32 %v242_v27, %v100_v55  ;;  %v163_v1 = vsub.f32 %v147_v23, %v161_v58 }
 0x113   :  { %v260_v59 = vpop.eup %259 }
 0x114   :  { %v73_v60 = vmul.f32 0.6931472, %v260_v59  ;;  %v374_v61 = vpop.xlane.xlu1 %153  ;;  %v104_v62 = vsel %vm51_vm0, %v102_v57, 0.0  ;;  %v262_v63 = vpop.eup %261 }
 0x115   :  { %105 = vadd.xlane.f32.xlu0 %v104_v62  ;;  %v97_v2 = vmul.f32 0.6931472, %v262_v63  ;;  %263 = vlog2.f32 %v374_v61  ;;  %vm179_vm13 = vweird.f32 %v374_v61  ;;  %v183_v54 = vand.u32 2147483647, %v374_v61 }
 0x116   :  { %v75_v0 = vsub.f32 %v59_v29, %v73_v60  ;;  %265 = vrcp.f32 %v368_v47 }
 0x117   :  { %v99_v4 = vsub.f32 %v356_v24, %v97_v2  ;;  %267 = vrcp.f32 %v371_v52 }
 0x118   :  { %v165_v3 = vsub.f32 %v163_v1, %v75_v0  ;;  %269 = vrcp.f32 %v365_v44 }
 0x119   :  { %v101_v6 = vsub.f32 %v99_v4, %v75_v0  ;;  %271 = vrcp.f32 %v374_v61 }
 0x11a   :  { %v167_v5 = vmul.f32 %v246_v35, %v165_v3 }
 0x11b   :  { %v264_v7 = vpop.eup %263  ;;  %v103_v9 = vmul.f32 %v248_v37, %v101_v6  ;;  %v135_v37 = vand.u32 2147483648, %v371_v52 }
 0x11c   :  { %v171_v8 = vsel %vm51_vm0, %v167_v5, 0.0  ;;  %v159_v10 = vmul.f32 0.6931472, %v264_v7  ;;  %v266_v16 = vpop.eup %265 }
 0x11d   :  { %172 = vadd.xlane.f32.xlu0 %v171_v8  ;;  %v107_v11 = vsel %vm51_vm0, %v103_v9, 0.0  ;;  %v268_v17 = vpop.eup %267  ;;  %v189_v19 = vmul.f32 %v266_v16, %v368_v47  ;;  %vm194_vm2 = vweird.f32 %v266_v16  ;;  %v136_v50 = vor.u32 1.1754944e-38, %v135_v37 }
 0x11e   :  { %108 = vadd.xlane.f32.xlu1 %v107_v11  ;;  %v162_v12 = vsub.f32 %v146_v32, %v159_v10  ;;  %v270_v18 = vpop.eup %269  ;;  %v125_v20 = vmul.f32 %v268_v17, %v371_v52  ;;  %v197_v32 = vand.u32 2147483647, %v368_v47  ;;  %vm130_vm4 = vweird.f32 %v268_v17  ;;  %vm395_vm5 = vmor %vm193_vm1, %vm194_vm2 }
 0x11f   :  { %v272_v21 = vpop.eup %271  ;;  %v111_v22 = vmul.f32 %v270_v18, %v365_v44  ;;  %v190_v25 = vsub.f32 1.0, %v189_v19  ;;  %vm116_vm7 = vweird.f32 %v270_v18  ;;  %vm405_vm8 = vmor %vm129_vm3, %vm130_vm4  ;;  %vm206_vm1 = vcmask 7168  }
 0x120   :  { %v164_v13 = vsub.f32 %v162_v12, %v74_v53  ;;  %v175_v23 = vmul.f32 %v272_v21, %v374_v61  ;;  %v126_v24 = vsub.f32 1.0, %v125_v20  ;;  %vm409_vm9 = vcmp.eq.f32.partialorder %v197_v32, 8.507059e+37  ;;  %vm417_vm11 = vmor %vm115_vm6, %vm116_vm7 }
 0x121   :  { %v112_v26 = vsub.f32 1.0, %v111_v22  ;;  %v191_v29 = vmul.f32 %v266_v16, %v190_v25  ;;  %vm180_vm10 = vweird.f32 %v272_v21  ;;  %v185_v53 = vand.u32 2147483648, %v374_v61 }
 0x122   :  { %v166_v14 = vmul.f32 %v252_v42, %v164_v13  ;;  %v127_v28 = vmul.f32 %v268_v17, %v126_v24  ;;  %v176_v30 = vsub.f32 1.0, %v175_v23  ;;  %v121_v42 = vand.u32 2147483648, %v365_v44  ;;  %vm181_vm15 = vmor %vm179_vm13, %vm180_vm10 }
 0x123   :  { %v113_v31 = vmul.f32 %v270_v18, %v112_v26  ;;  %v192_v35 = vadd.f32 %v266_v16, %v191_v29  ;;  %v186_v63 = vor.u32 1.1754944e-38, %v185_v53 }
 0x124   :  { %v168_v15 = vsel %vm51_vm0, %v166_v14, 0.0  ;;  %v128_v34 = vadd.f32 %v268_v17, %v127_v28  ;;  %v177_v36 = vmul.f32 %v272_v21, %v176_v30  ;;  %v122_v55 = vor.u32 1.1754944e-38, %v121_v42 }
 0x125   :  { %169 = vadd.xlane.f32.xlu2 %v168_v15  ;;  %v114_v41 = vadd.f32 %v270_v18, %v113_v31  ;;  %v196_v48 = vsel %vm395_vm5, %v266_v16, %v192_v35  ;;  %vm184_vm0 = vcmp.eq.f32.partialorder %v183_v54, 8.507059e+37  ;;  %v219_v16 = vlaneseq }
 0x126   :  { %v132_v47 = vsel %vm405_vm8, %v268_v17, %v128_v34  ;;  %v178_v49 = vadd.f32 %v272_v21, %v177_v36  ;;  %v201_v57 = vsel %vm409_vm9, %v200_v46, %v196_v48 }
 0x127   :  { %v137_v56 = vsel %vm134_vm12, %v136_v50, %v132_v47  ;;  %v118_v58 = vsel %vm417_vm11, %v270_v18, %v114_v41  ;;  %v220_v17 = vshrl.u32 %v219_v16, 7  ;;  %v222_v18 = vand.u32 127, %v219_v16 }
 0x128   :  { %v182_v62 = vsel %vm181_vm15, %v272_v21, %v178_v49  ;;  %v123_v0 = vsel %vm120_vm14, %v122_v55, %v118_v58 }
 0x129   :  { %v187_v1 = vsel %vm184_vm0, %v186_v63, %v182_v62  ;;  %vm223_vm2 = vcmp.eq.s32.totalorder %v220_v17, 0  ;;  %vm224_vm3 = vcmp.eq.s32.totalorder %v222_v18, 0 }
 0x12a   :  { %vm225_vm4 = vmand %vm223_vm2, %vm224_vm3 }
 0x188   :  { %v106_v27 = vpop.xlane.xlu0 %105 }
 0x189   :  { %v138_v3 = vmul.f32 %v123_v0, %v106_v27 }
 0x190   :  { %v173_v52 = vpop.xlane.xlu0 %172 }
 0x191   :  { %v109_v51 = vpop.xlane.xlu1 %108  ;;  %v203_v60 = vmul.f32 %v201_v57, %v173_v52 }
 0x192   :  { %v139_v59 = vmul.f32 %v137_v56, %v109_v51 }
 0x194   :  { %v205_v61 = vadd.f32 %v203_v60, %v139_v59 }
 0x196   :  { %v208_v7 = vsel %vm206_vm1, %v205_v61, 0.0 }
 0x198   :  { %v170_v2 = vpop.xlane.xlu2 %169 }
 0x199   :  { %v202_v4 = vmul.f32 %v187_v1, %v170_v2 }
 0x19b   :  { %v204_v5 = vadd.f32 %v202_v4, %v138_v3 }
 0x19d   :  { %v207_v6 = vsel %vm206_vm1, %v204_v5, 0.0 }
 0x19e   :  { %v209_v8 = vadd.f32 %v208_v7, %v207_v6 }
 0x1a0   :  { %210 = vadd.xlane.f32.xlu1 %v209_v8 }
 0x213   :  { %v211_v9 = vpop.xlane.xlu1 %210 }
 0x214   :  { %v212_v10 = vrot.slane %v211_v9, 4 }
 0x216   :  { %v213_v11 = vadd.f32 %v212_v10, %v211_v9 }
 0x218   :  { %v214_v12 = vrot.slane %v213_v11, 2 }
 0x21a   :  { %v215_v13 = vadd.f32 %v214_v12, %v213_v11 }
 0x21c   :  { %v216_v14 = vrot.slane %v215_v13, 1 }
 0x21e   :  { %v217_v15 = vadd.f32 %v216_v14, %v215_v13 }
 0x220   :  { %235 = vpush %v217_v15 }
 0x251   :  { %s236_s0 = spop %235 }
 0x252   :  { %v226_v19 = vstv %s236_s0 }
 0x253   :  { %v227_v20 = vsel %vm225_vm4, %v226_v19, 0.0 }
 0x254   :  { %228 = vst [vmem:[%s433_s2] sm:$0xff] %v227_v20 }
 0x255   :  { %233 = vsyncpa [#allocation3], 1 }
 0x256   :  { %234 = vsyncpa [#allocation5], 1 }

</bundles_post_ra>
